<compile_context>
chip_gen: v7x
topology: tpu7x:2x2x1
jax: 0.10.0
libtpu: 0.0.40
codegen_flags: <defaults>
</compile_context>

<pallas_src>
import math
from functools import partial

import jax
import jax.numpy as jnp
from jax.experimental import pallas as pl
from jax.experimental.pallas import tpu as pltpu


def _conv_tanh_kernel(x_ref, w_ref, b_ref, o_ref, p_ref, *, cin, kh, kw, wp, pw):
    # x_ref: (cin, HP*wp)     padded input, spatially flattened (row stride = wp)
    # w_ref: (cout, kh*kw*8)  conv weight, cin padded to 8 per tap (zeros in pad)
    # b_ref: (cout, 1)        bias (broadcast over lanes)
    # o_ref: (cout, pw)       lane-dense output; column p = h*wp + w
    # p_ref: (kh*kw*8, pw)    f32 scratch: in-kernel im2col patch matrix
    p_ref[...] = jnp.zeros_like(p_ref)  # zero the padded rows (avoid NaN*0)
    for ikh in range(kh):               # static unroll: 16 window copies
        for ikw in range(kw):
            t = ikh * kw + ikw
            start = ikh * wp + ikw      # static lane offset of this tap's window
            p_ref[pl.ds(t * 8, cin), :] = x_ref[:, pl.ds(start, pw)]
    acc = jnp.dot(w_ref[...], p_ref[...], preferred_element_type=jnp.float32)
    acc = acc + b_ref[...]
    o_ref[...] = jnp.tanh(acc).astype(o_ref.dtype)


def conv2d_tanh(x_nchw, weight, bias, *, padding=1):
    """x_nchw: (1, Cin, H, W); weight: (Cout, Cin, kH, kW); bias: (Cout,)."""
    N, Cin, H, W = x_nchw.shape
    Cout, _, kH, kW = weight.shape
    assert N == 1, "kernel specialized to the module's batch size of 1"

    H_out = H + 2 * padding - kH + 1
    W_out = W + 2 * padding - kW + 1
    WP = W + 2 * padding                        # padded row width (lane stride)
    PW = ((H_out * WP + 127) // 128) * 128      # lane-padded window width (256)
    max_start = (kH - 1) * WP + (kW - 1)
    HP = -(-(max_start + PW) // WP)             # rows so every window stays in-bounds
    extra_rows = HP - (H + 2 * padding)
    CIN_PAD = ((Cin + 7) // 8) * 8
    KPAD = kH * kW * CIN_PAD                    # 128

    # --- tiny glue (all on KB-sized arrays) ---
    x_pad = jnp.pad(x_nchw[0],
                    ((0, 0), (padding, padding + extra_rows), (padding, padding)))
    x_flat = x_pad.reshape(Cin, HP * WP)                                   # (3, 323)
    w_r = jnp.transpose(weight, (0, 2, 3, 1))                              # (Cout,kH,kW,Cin)
    w_pad = jnp.pad(w_r, ((0, 0), (0, 0), (0, 0), (0, CIN_PAD - Cin)))
    w_pad = w_pad.reshape(Cout, KPAD)                                      # (18, 128)
    b_col = bias.reshape(Cout, 1).astype(jnp.float32)

    kernel = partial(_conv_tanh_kernel, cin=Cin, kh=kH, kw=kW, wp=WP, pw=PW)

    flops = 2 * Cout * (kH * kW * Cin) * (H_out * W_out)
    bytes_accessed = 4 * (x_flat.size + w_pad.size + b_col.size + Cout * PW)

    out_2d = pl.pallas_call(
        kernel,
        out_shape=jax.ShapeDtypeStruct((Cout, PW), x_nchw.dtype),
        in_specs=[
            pl.BlockSpec((Cin, HP * WP), lambda: (0, 0)),
            pl.BlockSpec((Cout, KPAD), lambda: (0, 0)),
            pl.BlockSpec((Cout, 1), lambda: (0, 0)),
        ],
        out_specs=pl.BlockSpec((Cout, PW), lambda: (0, 0)),
        scratch_shapes=[pltpu.VMEM((KPAD, PW), jnp.float32)],
        compiler_params=pltpu.CompilerParams(vmem_limit_bytes=2 * 1024 * 1024),
        cost_estimate=pl.CostEstimate(
            flops=flops,
            transcendentals=Cout * H_out * W_out,
            bytes_accessed=bytes_accessed),
    )(x_flat, w_pad, b_col)

    # (Cout, PW) -> (Cout, H_out, WP) -> drop wrap columns -> NCHW
    out = out_2d[:, : H_out * WP].reshape(Cout, H_out, WP)[:, :, :W_out]
    return out[None]


def init_params(key, in_ch=3, out_ch=18, k=4):
    # Deterministic init mimicking PyTorch Conv2d default (uniform, bound=1/sqrt(fan_in))
    fan_in = in_ch * k * k
    bound = 1.0 / math.sqrt(fan_in)
    kw_key, kb_key = jax.random.split(key)
    weight = jax.random.uniform(kw_key, (out_ch, in_ch, k, k),
                                minval=-bound, maxval=bound, dtype=jnp.float32)
    bias = jax.random.uniform(kb_key, (out_ch,),
                              minval=-bound, maxval=bound, dtype=jnp.float32)
    return weight, bias


if __name__ == "__main__":
    key = jax.random.PRNGKey(0)
    k_x, k_p = jax.random.split(key)

    # input consistent with the module: (1, 3, 15, 15)
    x = jax.random.normal(k_x, (1, 3, 15, 15), dtype=jnp.float32)
    weight, bias = init_params(k_p)

    fwd = jax.jit(conv2d_tanh)
    y = jax.block_until_ready(fwd(x, weight, bias))
    assert y.shape == (1, 18, 14, 14), y.shape

    # sanity check against pure-JAX reference (lax conv)
    ref = jax.lax.conv_general_dilated(
        x, weight, window_strides=(1, 1), padding=((1, 1), (1, 1)),
        dimension_numbers=("NCHW", "OIHW", "NCHW"))
    ref = jnp.tanh(ref + bias.reshape(1, -1, 1, 1))
    assert jnp.allclose(y, ref, atol=1e-5, rtol=1e-5), \
        float(jnp.max(jnp.abs(y - ref)))

    print("KERNEL_OK")
</pallas_src>

<mosaic_0001>
module attributes {stable_mosaic.version = 11 : i64} {
  func.func @_conv_tanh_kernel(%arg0: memref<3x323xf32, #tpu.memory_space<vmem>>, %arg1: memref<18x128xf32, #tpu.memory_space<vmem>>, %arg2: memref<18x1xf32, #tpu.memory_space<vmem>>, %arg3: memref<18x256xf32, #tpu.memory_space<vmem>>, %arg4: memref<128x256xf32, #tpu.memory_space<vmem>>) attributes {dimension_semantics = [], scalar_prefetch = 0 : i64, scratch_operands = 1 : i64, tpu.core_type = #tpu.core_type<tc>} {
    %cst = arith.constant 0.000000e+00 : f32
    %0 = vector.broadcast %cst : f32 to vector<128x256xf32>
    %c0 = arith.constant 0 : index
    %c0_0 = arith.constant 0 : index
    %1 = vector.load %arg4[%c0, %c0_0] : memref<128x256xf32, #tpu.memory_space<vmem>>, vector<128x256xf32>
    tpu.vector_store %arg4[%c0, %c0_0], %0 {strides = array<i32>} : memref<128x256xf32, #tpu.memory_space<vmem>>, vector<128x256xf32>,
    %c0_1 = arith.constant 0 : index
    %c0_2 = arith.constant 0 : index
    %2 = vector.load %arg0[%c0_1, %c0_2] : memref<3x323xf32, #tpu.memory_space<vmem>>, vector<3x256xf32>
    %c0_3 = arith.constant 0 : index
    %c0_4 = arith.constant 0 : index
    %3 = vector.load %arg4[%c0_3, %c0_4] : memref<128x256xf32, #tpu.memory_space<vmem>>, vector<3x256xf32>
    tpu.vector_store %arg4[%c0_3, %c0_4], %2 {strides = array<i32>} : memref<128x256xf32, #tpu.memory_space<vmem>>, vector<3x256xf32>,
    %c0_5 = arith.constant 0 : index
    %c1 = arith.constant 1 : index
    %4 = vector.load %arg0[%c0_5, %c1] : memref<3x323xf32, #tpu.memory_space<vmem>>, vector<3x256xf32>
    %c8 = arith.constant 8 : index
    %c0_6 = arith.constant 0 : index
    %5 = vector.load %arg4[%c8, %c0_6] : memref<128x256xf32, #tpu.memory_space<vmem>>, vector<3x256xf32>
    tpu.vector_store %arg4[%c8, %c0_6], %4 {strides = array<i32>} : memref<128x256xf32, #tpu.memory_space<vmem>>, vector<3x256xf32>,
    %c0_7 = arith.constant 0 : index
    %c2 = arith.constant 2 : index
    %6 = vector.load %arg0[%c0_7, %c2] : memref<3x323xf32, #tpu.memory_space<vmem>>, vector<3x256xf32>
    %c16 = arith.constant 16 : index
    %c0_8 = arith.constant 0 : index
    %7 = vector.load %arg4[%c16, %c0_8] : memref<128x256xf32, #tpu.memory_space<vmem>>, vector<3x256xf32>
    tpu.vector_store %arg4[%c16, %c0_8], %6 {strides = array<i32>} : memref<128x256xf32, #tpu.memory_space<vmem>>, vector<3x256xf32>,
    %c0_9 = arith.constant 0 : index
    %c3 = arith.constant 3 : index
    %8 = vector.load %arg0[%c0_9, %c3] : memref<3x323xf32, #tpu.memory_space<vmem>>, vector<3x256xf32>
    %c24 = arith.constant 24 : index
    %c0_10 = arith.constant 0 : index
    %9 = vector.load %arg4[%c24, %c0_10] : memref<128x256xf32, #tpu.memory_space<vmem>>, vector<3x256xf32>
    tpu.vector_store %arg4[%c24, %c0_10], %8 {strides = array<i32>} : memref<128x256xf32, #tpu.memory_space<vmem>>, vector<3x256xf32>,
    %c0_11 = arith.constant 0 : index
    %c17 = arith.constant 17 : index
    %10 = vector.load %arg0[%c0_11, %c17] : memref<3x323xf32, #tpu.memory_space<vmem>>, vector<3x256xf32>
    %c32 = arith.constant 32 : index
    %c0_12 = arith.constant 0 : index
    %11 = vector.load %arg4[%c32, %c0_12] : memref<128x256xf32, #tpu.memory_space<vmem>>, vector<3x256xf32>
    tpu.vector_store %arg4[%c32, %c0_12], %10 {strides = array<i32>} : memref<128x256xf32, #tpu.memory_space<vmem>>, vector<3x256xf32>,
    %c0_13 = arith.constant 0 : index
    %c18 = arith.constant 18 : index
    %12 = vector.load %arg0[%c0_13, %c18] : memref<3x323xf32, #tpu.memory_space<vmem>>, vector<3x256xf32>
    %c40 = arith.constant 40 : index
    %c0_14 = arith.constant 0 : index
    %13 = vector.load %arg4[%c40, %c0_14] : memref<128x256xf32, #tpu.memory_space<vmem>>, vector<3x256xf32>
    tpu.vector_store %arg4[%c40, %c0_14], %12 {strides = array<i32>} : memref<128x256xf32, #tpu.memory_space<vmem>>, vector<3x256xf32>,
    %c0_15 = arith.constant 0 : index
    %c19 = arith.constant 19 : index
    %14 = vector.load %arg0[%c0_15, %c19] : memref<3x323xf32, #tpu.memory_space<vmem>>, vector<3x256xf32>
    %c48 = arith.constant 48 : index
    %c0_16 = arith.constant 0 : index
    %15 = vector.load %arg4[%c48, %c0_16] : memref<128x256xf32, #tpu.memory_space<vmem>>, vector<3x256xf32>
    tpu.vector_store %arg4[%c48, %c0_16], %14 {strides = array<i32>} : memref<128x256xf32, #tpu.memory_space<vmem>>, vector<3x256xf32>,
    %c0_17 = arith.constant 0 : index
    %c20 = arith.constant 20 : index
    %16 = vector.load %arg0[%c0_17, %c20] : memref<3x323xf32, #tpu.memory_space<vmem>>, vector<3x256xf32>
    %c56 = arith.constant 56 : index
    %c0_18 = arith.constant 0 : index
    %17 = vector.load %arg4[%c56, %c0_18] : memref<128x256xf32, #tpu.memory_space<vmem>>, vector<3x256xf32>
    tpu.vector_store %arg4[%c56, %c0_18], %16 {strides = array<i32>} : memref<128x256xf32, #tpu.memory_space<vmem>>, vector<3x256xf32>,
    %c0_19 = arith.constant 0 : index
    %c34 = arith.constant 34 : index
    %18 = vector.load %arg0[%c0_19, %c34] : memref<3x323xf32, #tpu.memory_space<vmem>>, vector<3x256xf32>
    %c64 = arith.constant 64 : index
    %c0_20 = arith.constant 0 : index
    %19 = vector.load %arg4[%c64, %c0_20] : memref<128x256xf32, #tpu.memory_space<vmem>>, vector<3x256xf32>
    tpu.vector_store %arg4[%c64, %c0_20], %18 {strides = array<i32>} : memref<128x256xf32, #tpu.memory_space<vmem>>, vector<3x256xf32>,
    %c0_21 = arith.constant 0 : index
    %c35 = arith.constant 35 : index
    %20 = vector.load %arg0[%c0_21, %c35] : memref<3x323xf32, #tpu.memory_space<vmem>>, vector<3x256xf32>
    %c72 = arith.constant 72 : index
    %c0_22 = arith.constant 0 : index
    %21 = vector.load %arg4[%c72, %c0_22] : memref<128x256xf32, #tpu.memory_space<vmem>>, vector<3x256xf32>
    tpu.vector_store %arg4[%c72, %c0_22], %20 {strides = array<i32>} : memref<128x256xf32, #tpu.memory_space<vmem>>, vector<3x256xf32>,
    %c0_23 = arith.constant 0 : index
    %c36 = arith.constant 36 : index
    %22 = vector.load %arg0[%c0_23, %c36] : memref<3x323xf32, #tpu.memory_space<vmem>>, vector<3x256xf32>
    %c80 = arith.constant 80 : index
    %c0_24 = arith.constant 0 : index
    %23 = vector.load %arg4[%c80, %c0_24] : memref<128x256xf32, #tpu.memory_space<vmem>>, vector<3x256xf32>
    tpu.vector_store %arg4[%c80, %c0_24], %22 {strides = array<i32>} : memref<128x256xf32, #tpu.memory_space<vmem>>, vector<3x256xf32>,
    %c0_25 = arith.constant 0 : index
    %c37 = arith.constant 37 : index
    %24 = vector.load %arg0[%c0_25, %c37] : memref<3x323xf32, #tpu.memory_space<vmem>>, vector<3x256xf32>
    %c88 = arith.constant 88 : index
    %c0_26 = arith.constant 0 : index
    %25 = vector.load %arg4[%c88, %c0_26] : memref<128x256xf32, #tpu.memory_space<vmem>>, vector<3x256xf32>
    tpu.vector_store %arg4[%c88, %c0_26], %24 {strides = array<i32>} : memref<128x256xf32, #tpu.memory_space<vmem>>, vector<3x256xf32>,
    %c0_27 = arith.constant 0 : index
    %c51 = arith.constant 51 : index
    %26 = vector.load %arg0[%c0_27, %c51] : memref<3x323xf32, #tpu.memory_space<vmem>>, vector<3x256xf32>
    %c96 = arith.constant 96 : index
    %c0_28 = arith.constant 0 : index
    %27 = vector.load %arg4[%c96, %c0_28] : memref<128x256xf32, #tpu.memory_space<vmem>>, vector<3x256xf32>
    tpu.vector_store %arg4[%c96, %c0_28], %26 {strides = array<i32>} : memref<128x256xf32, #tpu.memory_space<vmem>>, vector<3x256xf32>,
    %c0_29 = arith.constant 0 : index
    %c52 = arith.constant 52 : index
    %28 = vector.load %arg0[%c0_29, %c52] : memref<3x323xf32, #tpu.memory_space<vmem>>, vector<3x256xf32>
    %c104 = arith.constant 104 : index
    %c0_30 = arith.constant 0 : index
    %29 = vector.load %arg4[%c104, %c0_30] : memref<128x256xf32, #tpu.memory_space<vmem>>, vector<3x256xf32>
    tpu.vector_store %arg4[%c104, %c0_30], %28 {strides = array<i32>} : memref<128x256xf32, #tpu.memory_space<vmem>>, vector<3x256xf32>,
    %c0_31 = arith.constant 0 : index
    %c53 = arith.constant 53 : index
    %30 = vector.load %arg0[%c0_31, %c53] : memref<3x323xf32, #tpu.memory_space<vmem>>, vector<3x256xf32>
    %c112 = arith.constant 112 : index
    %c0_32 = arith.constant 0 : index
    %31 = vector.load %arg4[%c112, %c0_32] : memref<128x256xf32, #tpu.memory_space<vmem>>, vector<3x256xf32>
    tpu.vector_store %arg4[%c112, %c0_32], %30 {strides = array<i32>} : memref<128x256xf32, #tpu.memory_space<vmem>>, vector<3x256xf32>,
    %c0_33 = arith.constant 0 : index
    %c54 = arith.constant 54 : index
    %32 = vector.load %arg0[%c0_33, %c54] : memref<3x323xf32, #tpu.memory_space<vmem>>, vector<3x256xf32>
    %c120 = arith.constant 120 : index
    %c0_34 = arith.constant 0 : index
    %33 = vector.load %arg4[%c120, %c0_34] : memref<128x256xf32, #tpu.memory_space<vmem>>, vector<3x256xf32>
    tpu.vector_store %arg4[%c120, %c0_34], %32 {strides = array<i32>} : memref<128x256xf32, #tpu.memory_space<vmem>>, vector<3x256xf32>,
    %c0_35 = arith.constant 0 : index
    %c0_36 = arith.constant 0 : index
    %34 = vector.load %arg1[%c0_35, %c0_36] : memref<18x128xf32, #tpu.memory_space<vmem>>, vector<18x128xf32>
    %c0_37 = arith.constant 0 : index
    %c0_38 = arith.constant 0 : index
    %35 = vector.load %arg4[%c0_37, %c0_38] : memref<128x256xf32, #tpu.memory_space<vmem>>, vector<128x256xf32>
    %cst_39 = arith.constant dense<0.000000e+00> : vector<18x256xf32>
    %36 = tpu.matmul %34, %35, %cst_39 {dimension_numbers = #tpu.dot_dimension_numbers<[1], [0], [0], [1], [0, 0, 1, 1], [], []>} : vector<18x128xf32>, vector<128x256xf32>, vector<18x256xf32> -> vector<18x256xf32>
    %c0_40 = arith.constant 0 : index
    %c0_41 = arith.constant 0 : index
    %37 = vector.load %arg2[%c0_40, %c0_41] : memref<18x1xf32, #tpu.memory_space<vmem>>, vector<18x1xf32>
    %38 = vector.broadcast %37 : vector<18x1xf32> to vector<18x256xf32>
    %39 = arith.addf %36, %38 : vector<18x256xf32>
    %40 = math.tanh %39 : vector<18x256xf32>
    %c0_42 = arith.constant 0 : index
    %c0_43 = arith.constant 0 : index
    %41 = vector.load %arg3[%c0_42, %c0_43] : memref<18x256xf32, #tpu.memory_space<vmem>>, vector<18x256xf32>
    tpu.vector_store %arg3[%c0_42, %c0_43], %40 {strides = array<i32>} : memref<18x256xf32, #tpu.memory_space<vmem>>, vector<18x256xf32>,
    return
  }
}

</mosaic_0001>

<bundles_post_ra>
// kernel: conv2d_tanh.1
= control target key start
LH: loop header
LB: loop body
LE: loop exit
PB: predicated region body
PF: predicated region fallthrough
CT: control target
= control target key end

     0   :  { %v569_v3 = vmov 0.0   ;;  %s570_s18 = smov 127   ;;  %s571_s21 = smov 126   ;;  %v585_v48 = vmov 0   ;;  %vm63_vm0 = vcmask 1039360   ;;  %vm81_vm1 = vcmask 1031168   ;;  %s784_s0 = inlined_call_operand.vmem [shape: f32[3,323], index: 0, kind: input, shape index: {}]   ;;  %s785_s2 = inlined_call_operand.vmem [shape: f32[18,1], index: 2, kind: input, shape index: {}]   ;;  %s786_s1 = inlined_call_operand.vmem [shape: f32[18,128], index: 1, kind: input, shape index: {}]   ;;  %s787_s3 = inlined_call_operand.vmem [shape: f32[18,256], index: 3, kind: output, shape index: {}]  }
   0x1   :  { %v53_v0 = vld [vmem:[%s784_s0 + $0x8] sm:$0x7]  ;;  %v52_v1 = vld [vmem:[%s784_s0] sm:$0x77]  ;;  %16 = vst [vmem:[#allocation2 + $0x10] sm:$0xff] %v569_v3  ;;  %17 = vst [vmem:[#allocation2 + $0x18] sm:$0xff] %v569_v3  ;;  %439 = vmatprep.mubr.f32.mxu0 %v569_v3  ;;  %445 = vmatprep.mubr.f32.mxu1 %v569_v3 }
   0x2   :  { %v70_v2 = vld [vmem:[%s784_s0] sm:$0x77]  ;;  %14 = vst [vmem:[#allocation2] sm:$0xff] %v569_v3  ;;  %15 = vst [vmem:[#allocation2 + $0x8] sm:$0xff] %v569_v3  ;;  %61 = vrot.lane.b32.xlu0 %v53_v0, %s570_s18  ;;  %57 = vrot.lane.b32.xlu1 %v52_v1, %s570_s18  ;;  %v56_v4 = vcombine.high %v52_v1, %v52_v1  ;;  %v71_v8 = vld [vmem:[%s784_s0 + $0x8] sm:$0x7] }
   0x3   :  { %18 = vst [vmem:[#allocation2 + $0x20] sm:$0xff] %v569_v3  ;;  %19 = vst [vmem:[#allocation2 + $0x28] sm:$0xff] %v569_v3  ;;  %v74_v5 = vcombine.high %v70_v2, %v70_v2  ;;  %v88_v6 = vld [vmem:[%s784_s0] sm:$0x77]  ;;  %s572_s24 = smov 125   ;;  %s573_s6 = smov 111   ;;  %539 = vset.pattern.permute.xlu1 %v585_v48  ;;  %540 = vset.pattern.permute.xlu0 %v585_v48 }
   0x4   :  { %20 = vst [vmem:[#allocation2 + $0x30] sm:$0xff] %v569_v3  ;;  %21 = vst [vmem:[#allocation2 + $0x38] sm:$0xff] %v569_v3  ;;  %v92_v7 = vcombine.high %v88_v6, %v88_v6  ;;  %v89_v9 = vld [vmem:[%s784_s0 + $0x8] sm:$0x7]  ;;  %v106_v10 = vld [vmem:[%s784_s0] sm:$0x77] }
   0x5   :  { %22 = vst [vmem:[#allocation2 + $0x40] sm:$0xff] %v569_v3  ;;  %23 = vst [vmem:[#allocation2 + $0x48] sm:$0xff] %v569_v3  ;;  %v46_v11 = vld [vmem:[%s784_s0] sm:$0x77]  ;;  %v110_v12 = vcombine.high %v106_v10, %v106_v10  ;;  %v107_v16 = vld [vmem:[%s784_s0 + $0x8] sm:$0x7] }
   0x6   :  { %24 = vst [vmem:[#allocation2 + $0x50] sm:$0xff] %v569_v3  ;;  %25 = vst [vmem:[#allocation2 + $0x58] sm:$0xff] %v569_v3  ;;  %77 = vrot.lane.b32.xlu1 %v74_v5, %s571_s21  ;;  %59 = vrot.lane.b32.xlu0 %v56_v4, %s570_s18  ;;  %v48_v13 = vcombine.high %v46_v11, %v46_v11  ;;  %v124_v14 = vld [vmem:[%s784_s0] sm:$0x77]  ;;  %s574_s9 = smov 110   ;;  %s575_s16 = smov 109  }
   0x7   :  { %26 = vst [vmem:[#allocation2 + $0x60] sm:$0xff] %v569_v3  ;;  %27 = vst [vmem:[#allocation2 + $0x68] sm:$0xff] %v569_v3  ;;  %v128_v15 = vcombine.high %v124_v14, %v124_v14  ;;  %v125_v17 = vld [vmem:[%s784_s0 + $0x8] sm:$0x7]  ;;  %v142_v18 = vld [vmem:[%s784_s0] sm:$0x77] }
   0x8   :  { %28 = vst [vmem:[#allocation2 + $0x70] sm:$0xff] %v569_v3  ;;  %29 = vst [vmem:[#allocation2 + $0x78] sm:$0xff] %v569_v3  ;;  %v146_v19 = vcombine.high %v142_v18, %v142_v18  ;;  %v160_v20 = vld [vmem:[%s784_s0] sm:$0x77]  ;;  %v143_v22 = vld [vmem:[%s784_s0 + $0x8] sm:$0x7] }
   0x9   :  { %30 = vst [vmem:[#allocation2 + $0x80] sm:$0xff] %v569_v3  ;;  %31 = vst [vmem:[#allocation2 + $0x88] sm:$0xff] %v569_v3  ;;  %v164_v21 = vcombine.high %v160_v20, %v160_v20  ;;  %s576_s19 = smov 108   ;;  %v161_v23 = vld [vmem:[%s784_s0 + $0x8] sm:$0x7]  ;;  %s577_s26 = smov 94  }
   0xa   :  { %32 = vst [vmem:[#allocation2 + $0x90] sm:$0xff] %v569_v3  ;;  %33 = vst [vmem:[#allocation2 + $0x98] sm:$0xff] %v569_v3  ;;  %95 = vrot.lane.b32.xlu1 %v92_v7, %s572_s24  ;;  %79 = vrot.lane.b32.xlu0 %v71_v8, %s571_s21  ;;  %v178_v24 = vld [vmem:[%s784_s0] sm:$0x77]  ;;  %v179_v28 = vld [vmem:[%s784_s0 + $0x8] sm:$0x7] }
   0xb   :  { %34 = vst [vmem:[#allocation2 + $0xa0] sm:$0xff] %v569_v3  ;;  %35 = vst [vmem:[#allocation2 + $0xa8] sm:$0xff] %v569_v3  ;;  %v182_v25 = vcombine.high %v178_v24, %v178_v24  ;;  %v196_v26 = vld [vmem:[%s784_s0] sm:$0x77]  ;;  %s578_s29 = smov 93   ;;  %s580_s12 = smov 91  }
   0xc   :  { %36 = vst [vmem:[#allocation2 + $0xb0] sm:$0xff] %v569_v3  ;;  %37 = vst [vmem:[#allocation2 + $0xb8] sm:$0xff] %v569_v3  ;;  %v200_v27 = vcombine.high %v196_v26, %v196_v26  ;;  %v197_v29 = vld [vmem:[%s784_s0 + $0x8] sm:$0x7]  ;;  %v214_v30 = vld [vmem:[%s784_s0] sm:$0x77] }
   0xd   :  { %38 = vst [vmem:[#allocation2 + $0xc0] sm:$0xff] %v569_v3  ;;  %39 = vst [vmem:[#allocation2 + $0xc8] sm:$0xff] %v569_v3  ;;  %v218_v31 = vcombine.high %v214_v30, %v214_v30  ;;  %v232_v32 = vld [vmem:[%s784_s0] sm:$0x77]  ;;  %v215_v34 = vld [vmem:[%s784_s0 + $0x8] sm:$0x7] }
   0xe   :  { %40 = vst [vmem:[#allocation2 + $0xd0] sm:$0xff] %v569_v3  ;;  %41 = vst [vmem:[#allocation2 + $0xd8] sm:$0xff] %v569_v3  ;;  %75 = vrot.lane.b32.xlu1 %v70_v2, %s571_s21  ;;  %97 = vrot.lane.b32.xlu0 %v89_v9, %s572_s24  ;;  %v236_v33 = vcombine.high %v232_v32, %v232_v32  ;;  %v233_v35 = vld [vmem:[%s784_s0 + $0x8] sm:$0x7]  ;;  %v250_v36 = vld [vmem:[%s784_s0] sm:$0x77] }
   0xf   :  { %42 = vst [vmem:[#allocation2 + $0xe0] sm:$0xff] %v569_v3  ;;  %43 = vst [vmem:[#allocation2 + $0xe8] sm:$0xff] %v569_v3  ;;  %v254_v37 = vcombine.high %v250_v36, %v250_v36  ;;  %v268_v38 = vld [vmem:[%s784_s0] sm:$0x77]  ;;  %v251_v40 = vld [vmem:[%s784_s0 + $0x8] sm:$0x7] }
  0x10   :  { %44 = vst [vmem:[#allocation2 + $0xf0] sm:$0xff] %v569_v3  ;;  %45 = vst [vmem:[#allocation2 + $0xf8] sm:$0xff] %v569_v3  ;;  %v272_v39 = vcombine.high %v268_v38, %v268_v38  ;;  %s582_s22 = smov 76   ;;  %v269_v41 = vld [vmem:[%s784_s0 + $0x8] sm:$0x7]  ;;  %s584_s5 = smov 74  }
  0x11   :  { %50 = vst [vmem:[#allocation2] sm:$0x7] %v46_v11  ;;  %51 = vst [vmem:[#allocation2 + $0x8] sm:$0x7] %v48_v13  ;;  %v286_v42 = vld [vmem:[%s784_s0] sm:$0x77] }
  0x12   :  { %113 = vrot.lane.b32.xlu1 %v110_v12, %s573_s6  ;;  %93 = vrot.lane.b32.xlu0 %v88_v6, %s572_s24  ;;  %v290_v43 = vcombine.high %v286_v42, %v286_v42  ;;  %v304_v44 = vld [vmem:[%s784_s0] sm:$0x77]  ;;  %v287_v46 = vld [vmem:[%s784_s0 + $0x8] sm:$0x7]  ;;  %vm99_vm2 = vcmask 1022976   ;;  %vm117_vm3 = vcmask 908288  }
  0x13   :  { %v308_v45 = vcombine.high %v304_v44, %v304_v44  ;;  %v305_v47 = vld [vmem:[%s784_s0 + $0x8] sm:$0x7]  ;;  %v357_v49 = vld [vmem:[%s785_s2] sm:$0xff]  ;;  %v359_v51 = vld [vmem:[%s785_s2 + $0x10] sm:$0x3]  ;;  %vm135_vm4 = vcmask 900096  }
  0x14   :  { %v358_v50 = vld [vmem:[%s785_s2 + $0x8] sm:$0xff]  ;;  %vm153_vm5 = vcmask 891904   ;;  %vm171_vm6 = vcmask 883712   ;;  %vm189_vm7 = vcmask 769024   ;;  %vm207_vm8 = vcmask 760832  }
  0x15   :  { %vm225_vm9 = vcmask 752640   ;;  %vm243_vm10 = vcmask 744448   ;;  %vm261_vm11 = vcmask 629760   ;;  %vm279_vm12 = vcmask 621568  }
  0x16   :  { %131 = vrot.lane.b32.xlu1 %v128_v15, %s574_s9  ;;  %115 = vrot.lane.b32.xlu0 %v107_v16, %s573_s6  ;;  %vm297_vm13 = vcmask 613376   ;;  %vm315_vm14 = vcmask 605184  }
  0x18   :  { %v326_v61 = vld [vmem:[#allocation2 + $0x8] sm:$0xff]  ;;  %v325_v62 = vld [vmem:[#allocation2] sm:$0xff] }
  0x1a   :  { %111 = vrot.lane.b32.xlu1 %v106_v10, %s573_s6  ;;  %133 = vrot.lane.b32.xlu0 %v125_v17, %s574_s9 }
  0x1e   :  { %149 = vrot.lane.b32.xlu1 %v146_v19, %s575_s16  ;;  %129 = vrot.lane.b32.xlu0 %v124_v14, %s574_s9  ;;  %s579_s9 = smov 92  }
  0x22   :  { %167 = vrot.lane.b32.xlu1 %v164_v21, %s576_s19  ;;  %151 = vrot.lane.b32.xlu0 %v143_v22, %s575_s16 }
  0x26   :  { %147 = vrot.lane.b32.xlu1 %v142_v18, %s575_s16  ;;  %169 = vrot.lane.b32.xlu0 %v161_v23, %s576_s19 }
  0x2a   :  { %185 = vrot.lane.b32.xlu1 %v182_v25, %s577_s26  ;;  %165 = vrot.lane.b32.xlu0 %v160_v20, %s576_s19  ;;  %s581_s19 = smov 77  }
  0x2e   :  { %203 = vrot.lane.b32.xlu1 %v200_v27, %s578_s29  ;;  %187 = vrot.lane.b32.xlu0 %v179_v28, %s577_s26 }
  0x32   :  { %183 = vrot.lane.b32.xlu1 %v178_v24, %s577_s26  ;;  %205 = vrot.lane.b32.xlu0 %v197_v29, %s578_s29 }
  0x36   :  { %221 = vrot.lane.b32.xlu1 %v218_v31, %s579_s9  ;;  %201 = vrot.lane.b32.xlu0 %v196_v26, %s578_s29  ;;  %s583_s29 = smov 75  }
  0x3a   :  { %239 = vrot.lane.b32.xlu1 %v236_v33, %s580_s12  ;;  %223 = vrot.lane.b32.xlu0 %v215_v34, %s579_s9 }
  0x3e   :  { %219 = vrot.lane.b32.xlu1 %v214_v30, %s579_s9  ;;  %241 = vrot.lane.b32.xlu0 %v233_v35, %s580_s12 }
  0x42   :  { %257 = vrot.lane.b32.xlu1 %v254_v37, %s581_s19  ;;  %237 = vrot.lane.b32.xlu0 %v232_v32, %s580_s12 }
  0x46   :  { %275 = vrot.lane.b32.xlu1 %v272_v39, %s582_s22  ;;  %259 = vrot.lane.b32.xlu0 %v251_v40, %s581_s19 }
  0x4a   :  { %255 = vrot.lane.b32.xlu1 %v250_v36, %s581_s19  ;;  %277 = vrot.lane.b32.xlu0 %v269_v41, %s582_s22 }
  0x4e   :  { %293 = vrot.lane.b32.xlu1 %v290_v43, %s583_s29  ;;  %273 = vrot.lane.b32.xlu0 %v268_v38, %s582_s22 }
  0x52   :  { %311 = vrot.lane.b32.xlu1 %v308_v45, %s584_s5  ;;  %295 = vrot.lane.b32.xlu0 %v287_v46, %s583_s29 }
  0x56   :  { %291 = vrot.lane.b32.xlu1 %v286_v42, %s583_s29  ;;  %313 = vrot.lane.b32.xlu0 %v305_v47, %s584_s5 }
  0x5a   :  { %309 = vrot.lane.b32.xlu0 %v304_v44, %s584_s5  ;;  %362 = vperm.xlu1 %539, %v357_v49  }
  0x5e   :  { %367 = vperm.xlu0 %540, %v358_v50   ;;  %372 = vperm.xlu1 %539, %v359_v51  }
  0x74   :  { %v62_v52 = vpop.permute.xlu0 %61  ;;  %v58_v53 = vpop.permute.xlu1 %57 }
  0x78   :  { %v78_v54 = vpop.permute.xlu1 %77  ;;  %v60_v55 = vpop.permute.xlu0 %59 }
  0x79   :  { %v64_v56 = vsel %vm63_vm0, %v58_v53, %v60_v55  ;;  %v65_v57 = vsel %vm63_vm0, %v60_v55, %v62_v52 }
  0x7a   :  { %68 = vst [vmem:[#allocation2 + $0x10] sm:$0x7] %v64_v56  ;;  %69 = vst [vmem:[#allocation2 + $0x18] sm:$0x7] %v65_v57 }
  0x7c   :  { %v96_v58 = vpop.permute.xlu1 %95  ;;  %v80_v59 = vpop.permute.xlu0 %79 }
  0x7d   :  { %v83_v60 = vsel %vm81_vm1, %v78_v54, %v80_v59 }
  0x7e   :  { %87 = vst [vmem:[#allocation2 + $0x28] sm:$0x7] %v83_v60 }
  0x80   :  { %v76_v63 = vpop.permute.xlu1 %75  ;;  %v98_v0 = vpop.permute.xlu0 %97 }
  0x81   :  { %v82_v1 = vsel %vm81_vm1, %v76_v63, %v78_v54  ;;  %v101_v2 = vsel %vm99_vm2, %v96_v58, %v98_v0  ;;  %v328_v4 = vld [vmem:[#allocation2 + $0x18] sm:$0xff]  ;;  %v327_v5 = vld [vmem:[#allocation2 + $0x10] sm:$0xff] }
  0x82   :  { %86 = vst [vmem:[#allocation2 + $0x20] sm:$0x7] %v82_v1  ;;  %105 = vst [vmem:[#allocation2 + $0x38] sm:$0x7] %v101_v2  ;;  %v474_v6 = vpack.c.bf16 %v328_v4, %v326_v61  ;;  %v476_v7 = vpack.c.bf16 %v327_v5, %v325_v62 }
  0x84   :  { %v114_v8 = vpop.permute.xlu1 %113  ;;  %v94_v9 = vpop.permute.xlu0 %93  ;;  %475 = vmatprep.subr.bf16.mxu0 %v474_v6  ;;  %506 = vmatprep.subr.bf16.mxu1 %v474_v6 }
  0x85   :  { %v100_v10 = vsel %vm99_vm2, %v94_v9, %v96_v58  ;;  %477 = vmatpush1.bf16.msra.mxu0 %v476_v7  ;;  %514 = vmatpush1.bf16.msra.mxu1 %v476_v7  ;;  %v330_v14 = vld [vmem:[#allocation2 + $0x28] sm:$0xff] }
  0x86   :  { %104 = vst [vmem:[#allocation2 + $0x30] sm:$0x7] %v100_v10 }
  0x88   :  { %v132_v11 = vpop.permute.xlu1 %131  ;;  %v116_v12 = vpop.permute.xlu0 %115 }
  0x89   :  { %v119_v13 = vsel %vm117_vm3, %v114_v8, %v116_v12  ;;  %v332_v15 = vld [vmem:[#allocation2 + $0x38] sm:$0xff]  ;;  %v329_v21 = vld [vmem:[#allocation2 + $0x20] sm:$0xff] }
  0x8a   :  { %123 = vst [vmem:[#allocation2 + $0x48] sm:$0x7] %v119_v13  ;;  %v478_v16 = vpack.c.bf16 %v332_v15, %v330_v14 }
  0x8c   :  { %v112_v17 = vpop.permute.xlu1 %111  ;;  %v134_v18 = vpop.permute.xlu0 %133  ;;  %479 = vmatprep.subr.bf16.mxu0 %v478_v16  ;;  %507 = vmatprep.subr.bf16.mxu1 %v478_v16 }
  0x8d   :  { %v118_v19 = vsel %vm117_vm3, %v112_v17, %v114_v8  ;;  %v137_v20 = vsel %vm135_vm4, %v132_v11, %v134_v18  ;;  %v331_v22 = vld [vmem:[#allocation2 + $0x30] sm:$0xff] }
  0x8e   :  { %122 = vst [vmem:[#allocation2 + $0x40] sm:$0x7] %v118_v19  ;;  %141 = vst [vmem:[#allocation2 + $0x58] sm:$0x7] %v137_v20  ;;  %v480_v23 = vpack.c.bf16 %v331_v22, %v329_v21 }
  0x90   :  { %v150_v24 = vpop.permute.xlu1 %149  ;;  %v130_v25 = vpop.permute.xlu0 %129  ;;  %481 = vmatpush1.bf16.msra.mxu0 %v480_v23  ;;  %515 = vmatpush1.bf16.msra.mxu1 %v480_v23 }
  0x91   :  { %v136_v26 = vsel %vm135_vm4, %v130_v25, %v132_v11  ;;  %v334_v30 = vld [vmem:[#allocation2 + $0x48] sm:$0xff] }
  0x92   :  { %140 = vst [vmem:[#allocation2 + $0x50] sm:$0x7] %v136_v26 }
  0x94   :  { %v168_v27 = vpop.permute.xlu1 %167  ;;  %v152_v28 = vpop.permute.xlu0 %151 }
  0x95   :  { %v155_v29 = vsel %vm153_vm5, %v150_v24, %v152_v28  ;;  %v336_v31 = vld [vmem:[#allocation2 + $0x58] sm:$0xff]  ;;  %v333_v37 = vld [vmem:[#allocation2 + $0x40] sm:$0xff] }
  0x96   :  { %159 = vst [vmem:[#allocation2 + $0x68] sm:$0x7] %v155_v29  ;;  %v482_v32 = vpack.c.bf16 %v336_v31, %v334_v30 }
  0x98   :  { %v148_v33 = vpop.permute.xlu1 %147  ;;  %v170_v34 = vpop.permute.xlu0 %169  ;;  %483 = vmatprep.subr.bf16.mxu0 %v482_v32  ;;  %508 = vmatprep.subr.bf16.mxu1 %v482_v32 }
  0x99   :  { %v154_v35 = vsel %vm153_vm5, %v148_v33, %v150_v24  ;;  %v173_v36 = vsel %vm171_vm6, %v168_v27, %v170_v34  ;;  %v335_v38 = vld [vmem:[#allocation2 + $0x50] sm:$0xff] }
  0x9a   :  { %158 = vst [vmem:[#allocation2 + $0x60] sm:$0x7] %v154_v35  ;;  %177 = vst [vmem:[#allocation2 + $0x78] sm:$0x7] %v173_v36  ;;  %v484_v39 = vpack.c.bf16 %v335_v38, %v333_v37 }
  0x9c   :  { %v186_v40 = vpop.permute.xlu1 %185  ;;  %v166_v41 = vpop.permute.xlu0 %165  ;;  %485 = vmatpush1.bf16.msra.mxu0 %v484_v39  ;;  %516 = vmatpush1.bf16.msra.mxu1 %v484_v39 }
  0x9d   :  { %v172_v42 = vsel %vm171_vm6, %v166_v41, %v168_v27  ;;  %v338_v46 = vld [vmem:[#allocation2 + $0x68] sm:$0xff] }
  0x9e   :  { %176 = vst [vmem:[#allocation2 + $0x70] sm:$0x7] %v172_v42 }
  0xa0   :  { %v204_v43 = vpop.permute.xlu1 %203  ;;  %v188_v44 = vpop.permute.xlu0 %187 }
  0xa1   :  { %v191_v45 = vsel %vm189_vm7, %v186_v40, %v188_v44  ;;  %v340_v47 = vld [vmem:[#allocation2 + $0x78] sm:$0xff]  ;;  %v337_v53 = vld [vmem:[#allocation2 + $0x60] sm:$0xff] }
  0xa2   :  { %195 = vst [vmem:[#allocation2 + $0x88] sm:$0x7] %v191_v45  ;;  %v486_v48 = vpack.c.bf16 %v340_v47, %v338_v46 }
  0xa4   :  { %v184_v49 = vpop.permute.xlu1 %183  ;;  %v206_v50 = vpop.permute.xlu0 %205  ;;  %487 = vmatprep.subr.bf16.mxu0 %v486_v48  ;;  %509 = vmatprep.subr.bf16.mxu1 %v486_v48 }
  0xa5   :  { %v190_v51 = vsel %vm189_vm7, %v184_v49, %v186_v40  ;;  %v209_v52 = vsel %vm207_vm8, %v204_v43, %v206_v50  ;;  %v339_v54 = vld [vmem:[#allocation2 + $0x70] sm:$0xff]  ;;  %v322_v49 = vld [vmem:[%s786_s1] sm:$0xff]  ;;  %v323_v50 = vld [vmem:[%s786_s1 + $0x8] sm:$0xff] }
  0xa6   :  { %194 = vst [vmem:[#allocation2 + $0x80] sm:$0x7] %v190_v51  ;;  %213 = vst [vmem:[#allocation2 + $0x98] sm:$0x7] %v209_v52  ;;  %v488_v55 = vpack.c.bf16 %v339_v54, %v337_v53  ;;  %v324_v51 = vld [vmem:[%s786_s1 + $0x10] sm:$0x3] }
  0xa8   :  { %v222_v56 = vpop.permute.xlu1 %221  ;;  %v202_v57 = vpop.permute.xlu0 %201  ;;  %489 = vmatpush1.bf16.msra.mxu0 %v488_v55  ;;  %517 = vmatpush1.bf16.msra.mxu1 %v488_v55 }
  0xa9   :  { %v208_v58 = vsel %vm207_vm8, %v202_v57, %v204_v43  ;;  %v342_v62 = vld [vmem:[#allocation2 + $0x88] sm:$0xff] }
  0xaa   :  { %212 = vst [vmem:[#allocation2 + $0x90] sm:$0x7] %v208_v58 }
  0xac   :  { %v240_v59 = vpop.permute.xlu1 %239  ;;  %v224_v60 = vpop.permute.xlu0 %223 }
  0xad   :  { %v227_v61 = vsel %vm225_vm9, %v222_v56, %v224_v60  ;;  %v344_v63 = vld [vmem:[#allocation2 + $0x98] sm:$0xff]  ;;  %v341_v6 = vld [vmem:[#allocation2 + $0x80] sm:$0xff] }
  0xae   :  { %231 = vst [vmem:[#allocation2 + $0xa8] sm:$0x7] %v227_v61  ;;  %v490_v0 = vpack.c.bf16 %v344_v63, %v342_v62 }
  0xb0   :  { %v220_v1 = vpop.permute.xlu1 %219  ;;  %v242_v2 = vpop.permute.xlu0 %241  ;;  %491 = vmatprep.subr.bf16.mxu0 %v490_v0  ;;  %510 = vmatprep.subr.bf16.mxu1 %v490_v0 }
  0xb1   :  { %v226_v4 = vsel %vm225_vm9, %v220_v1, %v222_v56  ;;  %v245_v5 = vsel %vm243_vm10, %v240_v59, %v242_v2  ;;  %v343_v7 = vld [vmem:[#allocation2 + $0x90] sm:$0xff] }
  0xb2   :  { %230 = vst [vmem:[#allocation2 + $0xa0] sm:$0x7] %v226_v4  ;;  %249 = vst [vmem:[#allocation2 + $0xb8] sm:$0x7] %v245_v5  ;;  %v492_v8 = vpack.c.bf16 %v343_v7, %v341_v6 }
  0xb4   :  { %v258_v9 = vpop.permute.xlu1 %257  ;;  %v238_v10 = vpop.permute.xlu0 %237  ;;  %493 = vmatpush1.bf16.msra.mxu0 %v492_v8  ;;  %518 = vmatpush1.bf16.msra.mxu1 %v492_v8 }
  0xb5   :  { %v244_v11 = vsel %vm243_vm10, %v238_v10, %v240_v59  ;;  %v346_v15 = vld [vmem:[#allocation2 + $0xa8] sm:$0xff] }
  0xb6   :  { %248 = vst [vmem:[#allocation2 + $0xb0] sm:$0x7] %v244_v11 }
  0xb8   :  { %v276_v12 = vpop.permute.xlu1 %275  ;;  %v260_v13 = vpop.permute.xlu0 %259 }
  0xb9   :  { %v263_v14 = vsel %vm261_vm11, %v258_v9, %v260_v13  ;;  %v348_v16 = vld [vmem:[#allocation2 + $0xb8] sm:$0xff]  ;;  %v345_v22 = vld [vmem:[#allocation2 + $0xa0] sm:$0xff] }
  0xba   :  { %267 = vst [vmem:[#allocation2 + $0xc8] sm:$0x7] %v263_v14  ;;  %v494_v17 = vpack.c.bf16 %v348_v16, %v346_v15 }
  0xbc   :  { %v256_v18 = vpop.permute.xlu1 %255  ;;  %v278_v19 = vpop.permute.xlu0 %277  ;;  %495 = vmatprep.subr.bf16.mxu0 %v494_v17  ;;  %511 = vmatprep.subr.bf16.mxu1 %v494_v17 }
  0xbd   :  { %v262_v20 = vsel %vm261_vm11, %v256_v18, %v258_v9  ;;  %v281_v21 = vsel %vm279_vm12, %v276_v12, %v278_v19  ;;  %v347_v23 = vld [vmem:[#allocation2 + $0xb0] sm:$0xff] }
  0xbe   :  { %266 = vst [vmem:[#allocation2 + $0xc0] sm:$0x7] %v262_v20  ;;  %285 = vst [vmem:[#allocation2 + $0xd8] sm:$0x7] %v281_v21  ;;  %v496_v24 = vpack.c.bf16 %v347_v23, %v345_v22 }
  0xc0   :  { %v294_v25 = vpop.permute.xlu1 %293  ;;  %v274_v26 = vpop.permute.xlu0 %273  ;;  %497 = vmatpush1.bf16.msra.mxu0 %v496_v24  ;;  %519 = vmatpush1.bf16.msra.mxu1 %v496_v24 }
  0xc1   :  { %v280_v27 = vsel %vm279_vm12, %v274_v26, %v276_v12  ;;  %v350_v31 = vld [vmem:[#allocation2 + $0xc8] sm:$0xff] }
  0xc2   :  { %284 = vst [vmem:[#allocation2 + $0xd0] sm:$0x7] %v280_v27 }
  0xc4   :  { %v312_v28 = vpop.permute.xlu1 %311  ;;  %v296_v29 = vpop.permute.xlu0 %295 }
  0xc5   :  { %v299_v30 = vsel %vm297_vm13, %v294_v25, %v296_v29  ;;  %v352_v32 = vld [vmem:[#allocation2 + $0xd8] sm:$0xff]  ;;  %v349_v38 = vld [vmem:[#allocation2 + $0xc0] sm:$0xff] }
  0xc6   :  { %303 = vst [vmem:[#allocation2 + $0xe8] sm:$0x7] %v299_v30  ;;  %v498_v33 = vpack.c.bf16 %v352_v32, %v350_v31 }
  0xc8   :  { %v292_v34 = vpop.permute.xlu1 %291  ;;  %v314_v35 = vpop.permute.xlu0 %313  ;;  %499 = vmatprep.subr.bf16.mxu0 %v498_v33  ;;  %512 = vmatprep.subr.bf16.mxu1 %v498_v33 }
  0xc9   :  { %v298_v36 = vsel %vm297_vm13, %v292_v34, %v294_v25  ;;  %v317_v37 = vsel %vm315_vm14, %v312_v28, %v314_v35  ;;  %v351_v39 = vld [vmem:[#allocation2 + $0xd0] sm:$0xff] }
  0xca   :  { %302 = vst [vmem:[#allocation2 + $0xe0] sm:$0x7] %v298_v36  ;;  %321 = vst [vmem:[#allocation2 + $0xf8] sm:$0x7] %v317_v37  ;;  %v500_v40 = vpack.c.bf16 %v351_v39, %v349_v38 }
  0xcc   :  { %v310_v41 = vpop.permute.xlu0 %309  ;;  %501 = vmatpush1.bf16.msra.mxu0 %v500_v40  ;;  %520 = vmatpush1.bf16.msra.mxu1 %v500_v40 }
  0xcd   :  { %v316_v42 = vsel %vm315_vm14, %v310_v41, %v312_v28  ;;  %v354_v43 = vld [vmem:[#allocation2 + $0xe8] sm:$0xff] }
  0xce   :  { %320 = vst [vmem:[#allocation2 + $0xf0] sm:$0x7] %v316_v42 }
  0xd1   :  { %v356_v44 = vld [vmem:[#allocation2 + $0xf8] sm:$0xff]  ;;  %v353_v46 = vld [vmem:[#allocation2 + $0xe0] sm:$0xff] }
  0xd2   :  { %v502_v45 = vpack.c.bf16 %v356_v44, %v354_v43 }
  0xd4   :  { %503 = vmatprep.subr.bf16.mxu0 %v502_v45  ;;  %513 = vmatprep.subr.bf16.mxu1 %v502_v45 }
  0xd5   :  { %v355_v47 = vld [vmem:[#allocation2 + $0xf0] sm:$0xff] }
  0xd6   :  { %v504_v48 = vpack.c.bf16 %v355_v47, %v353_v46 }
  0xd8   :  { %505 = vmatpush1.bf16.msra.mxu0 %v504_v48  ;;  %521 = vmatpush1.bf16.msra.mxu1 %v504_v48 }
  0xd9   :  { %v363_v52 = vpop.permute.xlu1 %362 }
  0xdb   :  { %440 = vmatmul.mubr.f32.vlgmr.msra.gmra.mrb[0].mxu0 %v322_v49  ;;  %446 = vmatmul.mubr.f32.vlgmr.msra.gmra.mrb[0].mxu1 %v323_v50 }
  0xdc   :  { %451 = vmatprep.mubr.f32.mxu1 %v569_v3 }
  0xdd   :  { %v368_v53 = vpop.permute.xlu0 %367  ;;  %v373_v62 = vpop.permute.xlu1 %372 }
  0xdf   :  { %452 = vmatmul.mubr.f32.gmra.mrb[2].mxu1 %v324_v51 }
 0x1ae   :  { %v441_v54 = vpop.f32.mrb[0].mxu0  ;;  %v447_v55 = vpop.f32.mrb[0].mxu1 }
 0x1af   :  { %v442_v56 = vadd.f32 %v441_v54, %v363_v52  ;;  %v448_v57 = vadd.f32 %v447_v55, %v368_v53  ;;  %v443_v58 = vpop.f32.mrb[1].mxu0  ;;  %v449_v59 = vpop.f32.mrb[1].mxu1 }
 0x1b0   :  { %v444_v60 = vadd.f32 %v443_v58, %v363_v52  ;;  %v450_v61 = vadd.f32 %v449_v59, %v368_v53 }
 0x1b1   :  { %557 = vtanh.f32 %v442_v56 }
 0x1b2   :  { %559 = vtanh.f32 %v448_v57  ;;  %v453_v63 = vpop.f32.mrb[2].mxu1 }
 0x1b3   :  { %561 = vtanh.f32 %v444_v60  ;;  %v454_v3 = vadd.f32 %v453_v63, %v373_v62  ;;  %v455_v0 = vpop.f32.mrb[3].mxu1 }
 0x1b4   :  { %563 = vtanh.f32 %v450_v61  ;;  %v456_v1 = vadd.f32 %v455_v0, %v373_v62 }
 0x1b5   :  { %565 = vtanh.f32 %v454_v3 }
 0x1b6   :  { %567 = vtanh.f32 %v456_v1 }
 0x1bb   :  { %v558_v2 = vpop.eup %557 }
 0x1bc   :  { %v560_v4 = vpop.eup %559  ;;  %464 = vst [vmem:[%s787_s3] sm:$0xff] %v558_v2 }
 0x1bd   :  { %v562_v5 = vpop.eup %561  ;;  %466 = vst [vmem:[%s787_s3 + $0x10] sm:$0xff] %v560_v4 }
 0x1be   :  { %v564_v6 = vpop.eup %563  ;;  %465 = vst [vmem:[%s787_s3 + $0x8] sm:$0xff] %v562_v5 }
 0x1bf   :  { %v566_v7 = vpop.eup %565  ;;  %467 = vst [vmem:[%s787_s3 + $0x18] sm:$0xff] %v564_v6 }
 0x1c0   :  { %v568_v8 = vpop.eup %567  ;;  %468 = vst [vmem:[%s787_s3 + $0x20] sm:$0x3] %v566_v7 }
 0x1c1   :  { %469 = vst [vmem:[%s787_s3 + $0x28] sm:$0x3] %v568_v8 }

</bundles_post_ra>
